<compile_context>
chip_gen: v6e
topology: v6e:2x2x1
jax: 0.10.0
libtpu: 0.0.40
codegen_flags: <defaults>
</compile_context>

<pallas_src>
import functools

import jax
import jax.numpy as jnp
from jax.experimental import pallas as pl
from jax.experimental.pallas import tpu as pltpu


def _pick_block_hw(hw, target=2048):
    """Largest multiple-of-128 divisor of hw that is <= target (or hw itself)."""
    if hw <= target:
        return hw
    best = 0
    b = 128
    while b <= target:
        if hw % b == 0:
            best = b
        b += 128
    # TODO(synk): HW with no multiple-of-128 divisor falls back to whole-image blocks.
    return best if best else hw


def _aff_global_kernel(high_ref, low_ref, w1_ref, c1_ref, w2_ref, c2_ref,
                       x1_ref, acc_ref, *, vc, inv_hw):
    """Pass 1: accumulate GAP over HW tiles, then the tiny global-branch fc."""
    t = pl.program_id(1)

    @pl.when(t == 0)
    def _():
        acc_ref[...] = jnp.zeros_like(acc_ref)

    s = high_ref[0].astype(jnp.float32) + low_ref[0].astype(jnp.float32)  # (C, T)
    acc_ref[...] += jnp.sum(s, axis=1, keepdims=True)                      # (C, 1)

    @pl.when(t == pl.num_programs(1) - 1)
    def _():
        gap = acc_ref[...] * inv_hw + vc                                   # (C, 1) f32
        h = jnp.dot(w1_ref[...], gap.astype(w1_ref.dtype),
                    preferred_element_type=jnp.float32) + c1_ref[...]
        h = jnp.maximum(h, 0.0)
        x1 = jnp.dot(w2_ref[...], h.astype(w2_ref.dtype),
                     preferred_element_type=jnp.float32) + c2_ref[...]     # (C, 1)
        x1_ref[0] = x1


def _aff_blend_kernel(x1_ref, high_ref, low_ref, w1_ref, c1_ref, w2_ref, c2_ref,
                      out_ref, *, vc):
    """Pass 2: per HW tile local branch + sigmoid gate + blend."""
    high = high_ref[0]                                   # (C, T), input dtype
    low = low_ref[0]
    fusion = low + high + vc                             # stays in input dtype

    h = jnp.dot(w1_ref[...], fusion,
                preferred_element_type=jnp.float32) + c1_ref[...]          # (Cmid, T)
    h = jnp.maximum(h, 0.0)
    x2 = jnp.dot(w2_ref[...], h.astype(w2_ref.dtype),
                 preferred_element_type=jnp.float32) + c2_ref[...]         # (C, T)

    weight = jax.nn.sigmoid(x1_ref[0] + x2)              # f32, (C,1) + (C,T)
    delta = (low - high).astype(jnp.float32) + vc
    out = high.astype(jnp.float32) + weight * delta      # FMA-form blend
    out_ref[0] = out.astype(out_ref.dtype)


def aff_forward(high, low, params, vc=0.0, block_hw_target=2048):
    """AFF.forward(high, low, vc). high/low are NCHW; returns NCHW."""
    N, C, H, W = high.shape
    HW = H * W
    dtype = high.dtype
    high2 = high.reshape(N, C, HW)
    low2 = low.reshape(N, C, HW)

    eps = 1e-5
    w1, b1 = params["w1"], params["b1"]
    w2, b2 = params["w2"], params["b2"]
    Cmid = w1.shape[0]
    # Fold conv bias + inference-mode BatchNorm:
    #   bn(Wx + b) = (s*W)x + (s*(b - mean) + beta),  s = gamma / sqrt(var + eps)
    s1 = params["bn1_gamma"] / jnp.sqrt(params["bn1_var"] + eps)
    c1 = (s1 * (b1 - params["bn1_mean"]) + params["bn1_beta"]).reshape(Cmid, 1)
    s2 = params["bn2_gamma"] / jnp.sqrt(params["bn2_var"] + eps)
    c2 = (s2 * (b2 - params["bn2_mean"]) + params["bn2_beta"]).reshape(C, 1)
    c1 = c1.astype(jnp.float32)
    c2 = c2.astype(jnp.float32)
    # BN scale folded into the weights; weights kept in the input dtype
    # (bf16-friendly MXU feed; accumulation is f32 via preferred_element_type).
    w1f = (s1[:, None] * w1).astype(dtype)
    w2f = (s2[:, None] * w2).astype(dtype)

    block_hw = _pick_block_hw(HW, block_hw_target)
    n_tiles = HW // block_hw
    itemsize = jnp.dtype(dtype).itemsize
    vc = float(vc)

    hi_lo_spec = pl.BlockSpec((1, C, block_hw), lambda n, t: (n, 0, t))
    weight_specs = [
        pl.BlockSpec((Cmid, C), lambda n, t: (0, 0)),   # w1f
        pl.BlockSpec((Cmid, 1), lambda n, t: (0, 0)),   # c1
        pl.BlockSpec((C, Cmid), lambda n, t: (0, 0)),   # w2f
        pl.BlockSpec((C, 1), lambda n, t: (0, 0)),      # c2
    ]

    # Scoped VMEM sized from block + fp32 intermediate footprint (with headroom).
    tile_bytes = C * block_hw * itemsize
    inter_bytes = (Cmid + 3 * C) * block_hw * 4
    vmem_limit = max(int(3 * 2 * tile_bytes + inter_bytes) + (2 << 20), 8 << 20)

    # ---- pass 1: GAP + global branch -> x1 of shape (N, C, 1), f32
    global_kernel = functools.partial(_aff_global_kernel, vc=vc, inv_hw=1.0 / HW)
    x1 = pl.pallas_call(
        global_kernel,
        out_shape=jax.ShapeDtypeStruct((N, C, 1), jnp.float32),
        grid_spec=pltpu.PrefetchScalarGridSpec(
            num_scalar_prefetch=0,
            grid=(N, n_tiles),
            in_specs=[hi_lo_spec, hi_lo_spec] + weight_specs,
            out_specs=pl.BlockSpec((1, C, 1), lambda n, t: (n, 0, 0)),
            scratch_shapes=[pltpu.VMEM((C, 1), jnp.float32)],
        ),
        compiler_params=pltpu.CompilerParams(
            dimension_semantics=("parallel", "arbitrary"),
            vmem_limit_bytes=vmem_limit),
        cost_estimate=pl.CostEstimate(
            flops=2 * N * C * HW + 4 * N * C * Cmid,
            transcendentals=0,
            bytes_accessed=2 * N * C * HW * itemsize + N * C * 4),
    )(high2, low2, w1f, c1, w2f, c2)

    # ---- pass 2: local branch + gated blend, HW-tiled, both grid axes parallel
    blend_kernel = functools.partial(_aff_blend_kernel, vc=vc)
    out = pl.pallas_call(
        blend_kernel,
        out_shape=jax.ShapeDtypeStruct((N, C, HW), dtype),
        grid_spec=pltpu.PrefetchScalarGridSpec(
            num_scalar_prefetch=0,
            grid=(N, n_tiles),
            in_specs=[pl.BlockSpec((1, C, 1), lambda n, t: (n, 0, 0)),
                      hi_lo_spec, hi_lo_spec] + weight_specs,
            out_specs=hi_lo_spec,
        ),
        compiler_params=pltpu.CompilerParams(
            dimension_semantics=("parallel", "parallel"),
            vmem_limit_bytes=vmem_limit),
        cost_estimate=pl.CostEstimate(
            flops=N * HW * (4 * C * Cmid + 8 * C),
            transcendentals=N * C * HW,
            bytes_accessed=3 * N * C * HW * itemsize + N * C * 4),
    )(x1, high2, low2, w1f, c1, w2f, c2)

    return out.reshape(N, C, H, W)


def aff_reference(high, low, params, vc=0.0):
    """Pure-JAX reference mirroring the PyTorch module (eval-mode BN)."""
    eps = 1e-5

    def bc(v):
        return v[None, :, None, None]

    def fc(x):
        y = jnp.einsum('mc,nchw->nmhw', params["w1"], x) + bc(params["b1"])
        y = (y - bc(params["bn1_mean"])) / jnp.sqrt(bc(params["bn1_var"]) + eps)
        y = y * bc(params["bn1_gamma"]) + bc(params["bn1_beta"])
        y = jnp.maximum(y, 0.0)
        z = jnp.einsum('cm,nmhw->nchw', params["w2"], y) + bc(params["b2"])
        z = (z - bc(params["bn2_mean"])) / jnp.sqrt(bc(params["bn2_var"]) + eps)
        z = z * bc(params["bn2_gamma"]) + bc(params["bn2_beta"])
        return z

    fusion = low + high + vc
    gap = jnp.mean(fusion, axis=(2, 3), keepdims=True)
    weight = jax.nn.sigmoid(fc(gap) + fc(fusion))
    return (low + vc) * weight + high * (1 - weight)


if __name__ == "__main__":
    # in_low_channels == in_high_channels == out_channels (required for the
    # channel-wise gating to broadcast), reduction_ratio = 4.
    N, C, H, W = 2, 8, 16, 16
    reduction = 4
    Cmid = C // reduction

    key = jax.random.PRNGKey(0)
    ks = jax.random.split(key, 14)
    high = jax.random.normal(ks[0], (N, C, H, W), jnp.float32)
    low = jax.random.normal(ks[1], (N, C, H, W), jnp.float32)

    params = dict(
        w1=0.2 * jax.random.normal(ks[2], (Cmid, C), jnp.float32),
        b1=0.1 * jax.random.normal(ks[3], (Cmid,), jnp.float32),
        bn1_gamma=1.0 + 0.1 * jax.random.normal(ks[4], (Cmid,), jnp.float32),
        bn1_beta=0.1 * jax.random.normal(ks[5], (Cmid,), jnp.float32),
        bn1_mean=0.1 * jax.random.normal(ks[6], (Cmid,), jnp.float32),
        bn1_var=1.0 + 0.1 * jax.random.uniform(ks[7], (Cmid,), jnp.float32),
        w2=0.2 * jax.random.normal(ks[8], (C, Cmid), jnp.float32),
        b2=0.1 * jax.random.normal(ks[9], (C,), jnp.float32),
        bn2_gamma=1.0 + 0.1 * jax.random.normal(ks[10], (C,), jnp.float32),
        bn2_beta=0.1 * jax.random.normal(ks[11], (C,), jnp.float32),
        bn2_mean=0.1 * jax.random.normal(ks[12], (C,), jnp.float32),
        bn2_var=1.0 + 0.1 * jax.random.uniform(ks[13], (C,), jnp.float32),
    )

    out = jax.block_until_ready(aff_forward(high, low, params, vc=0.0))
    ref = aff_reference(high, low, params, vc=0.0)

    assert out.shape == (N, C, H, W)
    assert jnp.allclose(out, ref, atol=2e-5, rtol=2e-5), "kernel/reference mismatch"
    # TODO(synk): BatchNorm is eval-mode (running stats); PyTorch default
    # train-mode batch statistics are not reproduced.
    print("KERNEL_OK")
</pallas_src>

<mosaic_0001>
module attributes {stable_mosaic.version = 11 : i64} {
  func.func @_aff_global_kernel(%arg0: i32, %arg1: i32, %arg2: memref<1x8x256xf32, #tpu.memory_space<vmem>>, %arg3: memref<1x8x256xf32, #tpu.memory_space<vmem>>, %arg4: memref<2x8xf32, #tpu.memory_space<vmem>>, %arg5: memref<2x1xf32, #tpu.memory_space<vmem>>, %arg6: memref<8x2xf32, #tpu.memory_space<vmem>>, %arg7: memref<8x1xf32, #tpu.memory_space<vmem>>, %arg8: memref<1x8x1xf32, #tpu.memory_space<vmem>>, %arg9: memref<8x1xf32, #tpu.memory_space<vmem>>) attributes {dimension_semantics = [#tpu.dimension_semantics<parallel>, #tpu.dimension_semantics<arbitrary>], iteration_bounds = array<i64: 2, 1>, scalar_prefetch = 0 : i64, scratch_operands = 1 : i64, tpu.core_type = #tpu.core_type<tc>, window_params = [{transform_indices = @transform_0, window_bounds = array<i64: 1, 8, 256>}, {transform_indices = @transform_1, window_bounds = array<i64: 1, 8, 256>}, {pipeline_mode = #tpu.pipeline_mode<synchronous>, transform_indices = @transform_2, window_bounds = array<i64: 2, 8>}, {pipeline_mode = #tpu.pipeline_mode<synchronous>, transform_indices = @transform_3, window_bounds = array<i64: 2, 1>}, {pipeline_mode = #tpu.pipeline_mode<synchronous>, transform_indices = @transform_4, window_bounds = array<i64: 8, 2>}, {pipeline_mode = #tpu.pipeline_mode<synchronous>, transform_indices = @transform_5, window_bounds = array<i64: 8, 1>}, {transform_indices = @transform_6, window_bounds = array<i64: 1, 8, 1>}]} {
    %c0_i32 = arith.constant 0 : i32
    %0 = arith.cmpi eq, %arg1, %c0_i32 : i32
    %1 = arith.extui %0 : i1 to i32
    %c0_i32_0 = arith.constant 0 : i32
    %2 = arith.cmpi ne, %1, %c0_i32_0 : i32
    scf.if %2 {
      %cst_12 = arith.constant 0.000000e+00 : f32
      %16 = vector.broadcast %cst_12 : f32 to vector<8x1xf32>
      %c0_13 = arith.constant 0 : index
      %c0_14 = arith.constant 0 : index
      %17 = vector.load %arg9[%c0_13, %c0_14] : memref<8x1xf32, #tpu.memory_space<vmem>>, vector<8x1xf32>
      tpu.vector_store %arg9[%c0_13, %c0_14], %16 {strides = array<i32>} : memref<8x1xf32, #tpu.memory_space<vmem>>, vector<8x1xf32>,
    } else {
    }
    %c0 = arith.constant 0 : index
    %c0_1 = arith.constant 0 : index
    %c0_2 = arith.constant 0 : index
    %3 = vector.load %arg2[%c0, %c0_1, %c0_2] : memref<1x8x256xf32, #tpu.memory_space<vmem>>, vector<1x8x256xf32>
    %4 = vector.shape_cast %3 : vector<1x8x256xf32> to vector<8x256xf32>
    %c0_3 = arith.constant 0 : index
    %c0_4 = arith.constant 0 : index
    %c0_5 = arith.constant 0 : index
    %5 = vector.load %arg3[%c0_3, %c0_4, %c0_5] : memref<1x8x256xf32, #tpu.memory_space<vmem>>, vector<1x8x256xf32>
    %6 = vector.shape_cast %5 : vector<1x8x256xf32> to vector<8x256xf32>
    %7 = arith.addf %4, %6 : vector<8x256xf32>
    %c0_6 = arith.constant 0 : index
    %c0_7 = arith.constant 0 : index
    %8 = vector.load %arg9[%c0_6, %c0_7] : memref<8x1xf32, #tpu.memory_space<vmem>>, vector<8x1xf32>
    %cst = arith.constant dense<0.000000e+00> : vector<8xf32>
    %9 = vector.multi_reduction <add>, %7, %cst [1] : vector<8x256xf32> to vector<8xf32>
    %10 = vector.shape_cast %9 : vector<8xf32> to vector<8x1xf32>
    %11 = arith.addf %8, %10 : vector<8x1xf32>
    %c0_8 = arith.constant 0 : index
    %c0_9 = arith.constant 0 : index
    %12 = vector.load %arg9[%c0_8, %c0_9] : memref<8x1xf32, #tpu.memory_space<vmem>>, vector<8x1xf32>
    tpu.vector_store %arg9[%c0_8, %c0_9], %11 {strides = array<i32>} : memref<8x1xf32, #tpu.memory_space<vmem>>, vector<8x1xf32>,
    %c0_i32_10 = arith.constant 0 : i32
    %13 = arith.cmpi eq, %arg1, %c0_i32_10 : i32
    %14 = arith.extui %13 : i1 to i32
    %c0_i32_11 = arith.constant 0 : i32
    %15 = arith.cmpi ne, %14, %c0_i32_11 : i32
    scf.if %15 {
      %c0_12 = arith.constant 0 : index
      %c0_13 = arith.constant 0 : index
      %16 = vector.load %arg9[%c0_12, %c0_13] : memref<8x1xf32, #tpu.memory_space<vmem>>, vector<8x1xf32>
      %cst_14 = arith.constant 3.906250e-03 : f32
      %17 = vector.broadcast %cst_14 : f32 to vector<8x1xf32>
      %18 = arith.mulf %16, %17 : vector<8x1xf32>
      %cst_15 = arith.constant 0.000000e+00 : f32
      %19 = vector.broadcast %cst_15 : f32 to vector<8x1xf32>
      %20 = arith.addf %18, %19 : vector<8x1xf32>
      %c0_16 = arith.constant 0 : index
      %c0_17 = arith.constant 0 : index
      %21 = vector.load %arg4[%c0_16, %c0_17] : memref<2x8xf32, #tpu.memory_space<vmem>>, vector<2x8xf32>
      %cst_18 = arith.constant dense<0.000000e+00> : vector<2x1xf32>
      %22 = tpu.matmul %21, %20, %cst_18 {dimension_numbers = #tpu.dot_dimension_numbers<[1], [0], [0], [1], [0, 0, 1, 1], [], []>} : vector<2x8xf32>, vector<8x1xf32>, vector<2x1xf32> -> vector<2x1xf32>
      %c0_19 = arith.constant 0 : index
      %c0_20 = arith.constant 0 : index
      %23 = vector.load %arg5[%c0_19, %c0_20] : memref<2x1xf32, #tpu.memory_space<vmem>>, vector<2x1xf32>
      %24 = arith.addf %22, %23 : vector<2x1xf32>
      %cst_21 = arith.constant 0.000000e+00 : f32
      %25 = vector.broadcast %cst_21 : f32 to vector<2x1xf32>
      %26 = arith.maximumf %24, %25 : vector<2x1xf32>
      %c0_22 = arith.constant 0 : index
      %c0_23 = arith.constant 0 : index
      %27 = vector.load %arg6[%c0_22, %c0_23] : memref<8x2xf32, #tpu.memory_space<vmem>>, vector<8x2xf32>
      %cst_24 = arith.constant dense<0.000000e+00> : vector<8x1xf32>
      %28 = tpu.matmul %27, %26, %cst_24 {dimension_numbers = #tpu.dot_dimension_numbers<[1], [0], [0], [1], [0, 0, 1, 1], [], []>} : vector<8x2xf32>, vector<2x1xf32>, vector<8x1xf32> -> vector<8x1xf32>
      %c0_25 = arith.constant 0 : index
      %c0_26 = arith.constant 0 : index
      %29 = vector.load %arg7[%c0_25, %c0_26] : memref<8x1xf32, #tpu.memory_space<vmem>>, vector<8x1xf32>
      %30 = arith.addf %28, %29 : vector<8x1xf32>
      %c0_27 = arith.constant 0 : index
      %c0_28 = arith.constant 0 : index
      %c0_29 = arith.constant 0 : index
      %31 = vector.load %arg8[%c0_27, %c0_28, %c0_29] : memref<1x8x1xf32, #tpu.memory_space<vmem>>, vector<1x8x1xf32>
      %32 = vector.shape_cast %31 : vector<1x8x1xf32> to vector<8x1xf32>
      %33 = vector.shape_cast %30 : vector<8x1xf32> to vector<1x8x1xf32>
      tpu.vector_store %arg8[%c0_27, %c0_28, %c0_29], %33 {strides = array<i32>} : memref<1x8x1xf32, #tpu.memory_space<vmem>>, vector<1x8x1xf32>,
    } else {
    }
    return
  }
  func.func @transform_0(%arg0: i32, %arg1: i32) -> (i32, i32, i32) {
    %c0_i32 = arith.constant 0 : i32
    %c0_i32_0 = arith.constant 0 : i32
    return %arg0, %c0_i32, %arg1 : i32, i32, i32
  }
  func.func @transform_1(%arg0: i32, %arg1: i32) -> (i32, i32, i32) {
    %c0_i32 = arith.constant 0 : i32
    %c0_i32_0 = arith.constant 0 : i32
    return %arg0, %c0_i32, %arg1 : i32, i32, i32
  }
  func.func @transform_2(%arg0: i32, %arg1: i32) -> (i32, i32) {
    %c0_i32 = arith.constant 0 : i32
    %c0_i32_0 = arith.constant 0 : i32
    %c0_i32_1 = arith.constant 0 : i32
    return %c0_i32, %c0_i32_0 : i32, i32
  }
  func.func @transform_3(%arg0: i32, %arg1: i32) -> (i32, i32) {
    %c0_i32 = arith.constant 0 : i32
    %c0_i32_0 = arith.constant 0 : i32
    %c0_i32_1 = arith.constant 0 : i32
    return %c0_i32, %c0_i32_0 : i32, i32
  }
  func.func @transform_4(%arg0: i32, %arg1: i32) -> (i32, i32) {
    %c0_i32 = arith.constant 0 : i32
    %c0_i32_0 = arith.constant 0 : i32
    %c0_i32_1 = arith.constant 0 : i32
    return %c0_i32, %c0_i32_0 : i32, i32
  }
  func.func @transform_5(%arg0: i32, %arg1: i32) -> (i32, i32) {
    %c0_i32 = arith.constant 0 : i32
    %c0_i32_0 = arith.constant 0 : i32
    %c0_i32_1 = arith.constant 0 : i32
    return %c0_i32, %c0_i32_0 : i32, i32
  }
  func.func @transform_6(%arg0: i32, %arg1: i32) -> (i32, i32, i32) {
    %c0_i32 = arith.constant 0 : i32
    %c0_i32_0 = arith.constant 0 : i32
    %c0_i32_1 = arith.constant 0 : i32
    return %arg0, %c0_i32, %c0_i32_0 : i32, i32, i32
  }
}

</mosaic_0001>

<bundles_post_ra>
// kernel: tpu_custom_call.1
= control target key start
LH: loop header
LB: loop body
LE: loop exit
PB: predicated region body
PF: predicated region fallthrough
CT: control target
= control target key end

     0   :  { %11 = vsyncpa [#allocation4], 0  ;;  %s1002_s0 = inlined_call_operand.hbm [shape: f32[2,8,256], index: 0, kind: input, shape index: {}]   ;;  %s1003_s1 = inlined_call_operand.hbm [shape: f32[2,8,256], index: 1, kind: input, shape index: {}]   ;;  %s1004_s2 = inlined_call_operand.vmem [shape: f32[2,8], index: 2, kind: input, shape index: {}]   ;;  %s1005_s3 = inlined_call_operand.vmem [shape: f32[2,1], index: 3, kind: input, shape index: {}]   ;;  %s1006_s4 = inlined_call_operand.vmem [shape: f32[8,2], index: 4, kind: input, shape index: {}]   ;;  %s1007_s5 = inlined_call_operand.vmem [shape: f32[8,1], index: 5, kind: input, shape index: {}]   ;;  %s1008_s6 = inlined_call_operand.vmem [shape: f32[2,8,1], index: 6, kind: output, shape index: {}]  }
   0x1   :  { %13 = vsyncpa [#allocation4 + $0x1], 0 }
   0x2   :  { %14 = vsyncpa [#allocation6], 0 }
   0x3   :  { %16 = vsyncpa [#allocation6 + $0x1], 0  ;;  %s861_s21 = smov 0   ;;  %s863_s22 = smov 0  }
   0x4   :  { %s865_s23 = smov 0   ;;  %s867_s24 = smov 0  }
   0x5   :  { %s869_s25 = smov 0   ;;  %s871_s26 = smov 0  }
   0x6 LB: > { %s613_s27 = sadd.s32 4294967295, %s820_s26   ;;  %s34_s28 = sadd.s32 1, %s816_s25  ;;  %s820_s26 = sphi %s871_s26, %s22_s26   ;;  %s816_s25 = sphi %s869_s25, %s1017_s25   ;;  %s812_s24 = sphi %s867_s24, %s1016_s24   ;;  %s808_s23 = sphi %s865_s23, %s1015_s23   ;;  %s804_s22 = sphi %s863_s22, %s1014_s22   ;;  %s800_s21 = sphi %s861_s21, %s1013_s21  }
   0x7   : > { %p36_p0 = scmp.ge.s32.totalorder %s34_s28, 2  ;;  %s43_s29 = sadd.s32 1, %s808_s23 }
   0x8   : > { %p50_p1 = scmp.ne.s32.totalorder %s808_s23, %s804_s22  ;;  %p51_p2 = scmp.eq.s32.totalorder %s820_s26, 0 }
   0x9   : > { %s1019_s28 = smov (%p36_p0, %s34_s28), 0  ;;  %p56_p4 = scmp.ne.s32.totalorder %s804_s22, %s800_s21 }
   0xa   : > { %p897_p3 = por %p51_p2, %p50_p1  ;;  %s38_s7 = ssub.s32 %s816_s25, %s1019_s28 }
   0xb   : > { %p57_p5 = scmp.eq.s32.totalorder %s613_s27, 0  ;;  %p41_p6 = scmp.eq.s32.totalorder %s38_s7, 0 }
   0xc   : > { %p659_p8 = scmp.lt.s32.totalorder %s820_s26, 2  ;;  %s913_s10 = sand.u32 1, %s808_s23  }
   0xd   : > { %p904_p7 = por %p57_p5, %p56_p4  ;;  %s632_s11 = sshll.u32 %s816_s25, 8 }
   0xe   : > { %s910_s9 = scalar_select %p41_p6, %s808_s23, %s43_s29  }
   0xf   : > { %s617_s12 = sshll.u32 %s913_s10, 4  ;;  %s242_s15 = scalar_lea.hbm %s1002_s0, %s632_s11 }
  0x10   : > { %s234_s16 = scalar_lea.vmem [#allocation3], %s617_s12  ;;  %p922_p9 = pnand %p659_p8, %p897_p3 }
  0x11   : > { %s244_s17 = sshll.u32 %s234_s16, 4  ;;  %p623_p10 = scmp.ge.s32.totalorder %s820_s26, 1  ;;  %s245_s17 = int_to_ptr.vmem [resolvable:$true] %s244_s17 }
  0x12   : > { %p270_p11 = scmp.lt.s32.totalorder %s820_s26, 3  ;;  %s231_s19 = scalar_lea.sflag [#allocation4], %s913_s10 }
  0x13   : > { %p712_p12 = pneg %p922_p9  ;;  %s723_s20 = scalar_lea.vmem %s245_s17, 256 }
  0x14   : > { %p724_p13 = scmp.ne.s32.totalorder %s245_s17, %s723_s20  ;;  %s822_s21 = smov [#allocation3]  }
  0x15   : > { %s728_s27 = sshll.u32 %s822_s21, 4  ;;  %s729_s27 = int_to_ptr.vmem [resolvable:$false] %s728_s27 }
  0x16   : > { %p726_p0 = pnand %p724_p13, %p712_p12  ;;  %s730_s29 = scalar_lea.vmem %s729_s27, 512 }
  0x17   : > { %p731_p2 = scmp.lt.s32.totalorder %s245_s17, %s729_s27  ;;  %p732_p3 = scmp.lt.s32.totalorder %s730_s29, %s723_s20 }
  0x18   : > { %p727_p1 = pneg %p726_p0 }
  0x19   : > { %p733_p4 = por %p732_p3, %p731_p2 }
  0x1b   : > { %p734_p5 = pnand %p733_p4, %p727_p1 }
  0x1d   : > { %737 = shalt.err (!%p734_p5)
}
  0x1e   : > { %655 = dma.hbm_to_vmem [thread:$0]  (!%p922_p9), %s242_s15, 256, %s245_s17, %s231_s19  }
  0x1f   : > { %p940_p6 = pnand %p623_p10, %p270_p11  ;;  %s263_s14 = scalar_lea.hbm %s1003_s1, %s632_s11 }
  0x20   : > { %s255_s16 = scalar_lea.vmem [#allocation5], %s617_s12  ;;  %s252_s21 = scalar_lea.sflag [#allocation6], %s913_s10 }
  0x21   : > { %s265_s20 = sshll.u32 %s255_s16, 4  ;;  %s823_s15 = smov [#allocation5]   ;;  %s266_s20 = int_to_ptr.vmem [resolvable:$true] %s265_s20 }
  0x22   : > { %s751_s27 = scalar_lea.vmem %s266_s20, 256  ;;  %s756_s17 = sshll.u32 %s823_s15, 4  ;;  %s757_s17 = int_to_ptr.vmem [resolvable:$false] %s756_s17 }
  0x23   : > { %p752_p8 = scmp.ne.s32.totalorder %s266_s20, %s751_s27  ;;  %s758_s19 = scalar_lea.vmem %s757_s17, 512 }
  0x24   : > { %p759_p10 = scmp.lt.s32.totalorder %s266_s20, %s757_s17  ;;  %p760_p11 = scmp.lt.s32.totalorder %s758_s19, %s751_s27 }
  0x25   : > { %p754_p13 = pnand %p752_p8, %p712_p12 }
  0x26   : > { %p761_p1 = por %p760_p11, %p759_p10 }
  0x27   : > { %p755_p0 = pneg %p754_p13 }
  0x29   : > { %p762_p2 = pnand %p761_p1, %p755_p0 }
  0x2b   : > { %765 = shalt.err (!%p762_p2)
}
  0x2c   : > { %658 = dma.hbm_to_vmem [thread:$0]  (!%p922_p9), %s263_s14, 256, %s266_s20, %s252_s21  }
  0x2d   : > { %274 = sbr.rel (%p940_p6) target bundleno = 604 (0x25c), region = 44  ;;  %s276_s10 = sand.u32 (!%p940_p6), 1, %s804_s22  }
  0x2e   : > { %s624_s11 = sshll.u32 (!%p940_p6), %s276_s10, 4  ;;  %s277_s12 = scalar_lea.sflag (!%p940_p6), [#allocation4], %s276_s10 }
  0x2f   : > { %s280_s29 = scalar_lea.vmem (!%p940_p6), [#allocation3], %s624_s11 }
  0x32   : > { %791 = dma.done.wait (%p904_p7), %s277_s12, 256  }
  0x33   : > { %793 = vsyncadd (%p904_p7), %s277_s12, 4294967040  ;;  %s286_s7 = scalar_lea.sflag [#allocation6], %s276_s10  ;;  %s289_s13 = scalar_lea.vmem [#allocation5], %s624_s11 }
  0x34   : > { %795 = dma.done.wait (%p904_p7), %s286_s7, 256  }
  0x35   : > { %797 = vsyncadd (%p904_p7), %s286_s7, 4294967040  ;;  %vm332_vm0 = vcmask 7168   ;;  %v824_v0 = vmov 0.0   ;;  %v334_v1 = vld [vmem:[%s280_s29] sm:$0xff]  ;;  %v335_v2 = vld [vmem:[%s280_s29 + $0x8] sm:$0xff]  ;;  %vm825_vm1 = vmmov 0  }
  0x36   : > { %333 = vst.msk [vmem:[#allocation2] sm:$0xff] %vm332_vm0, %v824_v0  ;;  %638 = vmatprep.subr.mxu0 %v824_v0  ;;  %643 = vmatprep.subr.mxu1 %v824_v0  ;;  %v336_v3 = vld [vmem:[%s289_s13] sm:$0xff]  ;;  %v337_v4 = vld [vmem:[%s289_s13 + $0x8] sm:$0xff]  ;;  %vm355_vm2 = vcmask 64512   ;;  %vm436_vm3 = vcmask 1041408   ;;  %vm432_vm4 = vcmask 15360  }
  0x37   : > { %v338_v5 = vadd.f32 %v336_v3, %v334_v1  ;;  %v339_v6 = vadd.f32 %v337_v4, %v335_v2  ;;  %640 = vmatprep.mubr.msk.f32.mxu0 %vm825_vm1, %v824_v0  ;;  %645 = vmatprep.mubr.msk.f32.mxu1 %vm825_vm1, %v824_v0  ;;  %v353_v13 = vld [vmem:[%s1004_s2] sm:$0x3]  ;;  %p324_p7 = scmp.lt.s32.totalorder %s812_s24, 1 }
  0x38   : > { %v354_v14 = vld [vmem:[%s1005_s3] sm:$0x3] }
  0x39   : > { %v341_v7 = vadd.f32 %v339_v6, %v338_v5  ;;  %v430_v19 = vld [vmem:[%s1006_s4] sm:$0xff]  ;;  %s1021_s24 = smov (!%p324_p7, %s812_s24), 1 }
  0x3a   : > { %s626_s21 = sshll.u32 %s1021_s24, 3  ;;  %v431_v20 = vld [vmem:[%s1007_s5] sm:$0xff] }
  0x3b   : > { %342 = vadd.xlane.f32.xlu0 %v341_v7  ;;  %s327_s10 = scalar_lea.vmem %s1008_s6, %s626_s21 }
  0x3d   : > { %v340_v8 = vld [vmem:[#allocation2] sm:$0xff] }
  0xc4   : > { %v343_v9 = vpop.xlane.xlu0 %342 }
  0xc5   : > { %v344_v10 = vadd.f32 %v343_v9, %v340_v8 }
  0xc7   : > { %346 = vst.msk [vmem:[#allocation2] sm:$0xff] %vm332_vm0, %v344_v10 }
  0xce   : > { %v350_v11 = vld [vmem:[#allocation2] sm:$0xff] }
  0xcf   : > { %v351_v12 = vmul.f32 0.00390625, %v350_v11 }
  0xd1   : > { %639 = vmatpush3.msra.mxu0 %v351_v12 }
  0xd2   : > { %641 = vmatmul.mubr.msk.f32.vlgmr.msra.gmra.mxu0 %vm355_vm2, %v353_v13 }
 0x192   : > { %v425_v15 = vpop.f32.mrf.mxu0 }
 0x193   : > { %v426_v16 = vadd.f32 %v425_v15, %v354_v14 }
 0x194   : > { %v642_v17 = vpop.f32.mrf.mxu0 }
 0x195   : > { %v429_v18 = vmax.f32 %v426_v16, 0.0 }
 0x197   : > { %644 = vmatpush3.msk.msra.mxu1 %vm436_vm3, %v429_v18 }
 0x198   : > { %646 = vmatmul.mubr.msk.f32.vlgmr.msra.gmra.mxu1 %vm432_vm4, %v430_v19 }
 0x258   : > { %v506_v21 = vpop.f32.mrf.mxu1 }
 0x259   : > { %v507_v22 = vadd.f32 %v506_v21, %v431_v20 }
 0x25a   : > { %v647_v23 = vpop.f32.mrf.mxu1 }
 0x25b   : > { %510 = vst.msk [vmem:[%s327_s10] sm:$0xff] %vm332_vm0, %v507_v22 }
 0x25c PF: > { %s22_s26 = sadd.s32 1, %s820_s26   ;;  %s1013_s21 = smov %s804_s22 }
 0x25d   : > { %p19_p9 = scmp.ge.s32.totalorder %s22_s26, 4   ;;  %s1014_s22 = smov %s808_s23 }
 0x25e   : > { %s1015_s23 = smov %s910_s9  ;;  %s1016_s24 = smov %s816_s25 }
 0x25f   : > { %s1017_s25 = smov %s1019_s28  ;;  %21 = sbr.rel (!%p19_p9) target bundleno = 6 (0x6), region = 105 }
 0x264   :  { %530 = vsyncpa [#allocation4], 1 }
 0x265   :  { %532 = vsyncpa [#allocation4 + $0x1], 1 }
 0x266   :  { %533 = vsyncpa [#allocation6], 1 }
 0x267   :  { %535 = vsyncpa [#allocation6 + $0x1], 1 }

</bundles_post_ra>
